<compile_context>
chip_gen: v5e
topology: v5e:2x2
jax: 0.10.0
libtpu: 0.0.40
codegen_flags: <defaults>
</compile_context>

<pallas_src>
import functools

import jax
import jax.numpy as jnp
from jax.experimental import pallas as pl
from jax.experimental.pallas import tpu as pltpu


def _project3d_kernel(p_ref, pts_ref, o_ref, *, eps, use_w):
    """Per-(batch, row-chunk) projection.

    p_ref  : SMEM [B*12] prescaled row-major 3x4 projection coefficients
             (rows 0/1 already scaled by 2/(W-1) and 2/(H-1)).
    pts_ref: VMEM (3|4, rows, W) 3D points (x, y, z[, w]) for this block.
    o_ref  : VMEM (2, rows, W) normalized pixel coordinates (x plane, y plane).
    """
    base = pl.program_id(0) * 12

    # Widen on the VPU (free — plenty of idle VALU slots on a mem-bound
    # kernel); lets bf16 producers stream half the input bytes.
    x = pts_ref[0].astype(jnp.float32)
    y = pts_ref[1].astype(jnp.float32)
    z = pts_ref[2].astype(jnp.float32)

    def p(k):
        return p_ref[base + k]

    if use_w:
        w = pts_ref[3].astype(jnp.float32)
        cx = p(0) * x + p(1) * y + p(2) * z + p(3) * w
        cy = p(4) * x + p(5) * y + p(6) * z + p(7) * w
        cz = p(8) * x + p(9) * y + p(10) * z + p(11) * w
    else:
        # Homogeneous coordinate w == 1: the w column is an additive bias,
        # so the 4th point plane never leaves HBM (16 -> 12 B/px read).
        cx = p(0) * x + p(1) * y + p(2) * z + p(3)
        cy = p(4) * x + p(5) * y + p(6) * z + p(7)
        cz = p(8) * x + p(9) * y + p(10) * z + p(11)

    # One reciprocal + two multiplies instead of two per-lane divides.
    # approx=False keeps the 1e-4 tolerance vs. the exact-division reference.
    inv_z = pl.reciprocal(cz + eps, approx=False)

    o_ref[0] = (cx * inv_z - 1.0).astype(o_ref.dtype)
    o_ref[1] = (cy * inv_z - 1.0).astype(o_ref.dtype)


def _round_up(x, m):
    return (x + m - 1) // m * m


def _vmem_capacity_bytes(default=64 * 1024 * 1024):
    """Physical VMEM of the attached TPU; conservative v7x default if the
    query is unavailable (e.g. interpret mode)."""
    try:
        cap = getattr(pltpu.get_tpu_info(), "vmem_capacity_bytes", None)
        if cap:
            return int(cap)
    except Exception:
        pass
    return default


def _pick_block_rows(height, width, batch, max_block_px):
    """Largest sublane-friendly row chunk (multiple of 8 dividing `height`)
    such that (a) the double-buffered VMEM footprint stays within budget and
    (b) there are at least ~4 grid blocks in total (preferring an even count)
    so both v7x TensorCores and the input/output DMA pipeline stay busy even
    for batch size 1."""
    cands = [r for r in range(8, height + 1, 8) if height % r == 0]
    if not cands:                      # height is padded to 8, so unreachable
        cands = [height]
    min_row_blocks = max(1, -(-4 // batch))            # ceil(4 / batch)

    def pick(pool):
        # Prefer an even total block count (clean v7x core split), then the
        # biggest tile (per-step overhead ~0.35 us is negligible at >=32K px).
        return max(pool, key=lambda r: ((batch * (height // r)) % 2 == 0, r))

    pool = [r for r in cands
            if r * width <= max_block_px and height // r >= min_row_blocks]
    if pool:
        return pick(pool)
    pool = [r for r in cands if r * width <= max_block_px]
    if pool:
        return pick(pool)
    return min(cands)


def project_3d_planes(points, K, T, batch_size, height, width, eps=1e-7,
                      homogeneous_w=True, block_rows=None):
    """Pallas Project3D producing channel-first planes (the fast path).

    points: [B, C, H*W] with C >= 3 (C == 4 homogeneous; row 3 must be
            exactly 1 when homogeneous_w=True).  K, T: [B, 4, 4].
    Returns [B, 2, H, W] float32 (x plane, y plane) — the transpose of the
    PyTorch module's [B, H, W, 2].
    """
    in_planes = 3 if homogeneous_w else 4
    assert points.shape[0] == batch_size
    assert points.shape[2] == height * width
    assert points.shape[1] >= in_planes

    # Tiny per-batch 4x4 matmuls stay in XLA; fold the output normalization
    # into rows 0/1 of P:  out_x = 2*cam_x/((W-1)*(cam_z+eps)) - 1.
    # Flat 1-D coefficients avoid 2-D SMEM lane padding at large B.
    P = jnp.matmul(K.astype(jnp.float32), T.astype(jnp.float32))[:, :3, :]
    scale = jnp.array([2.0 / (width - 1), 2.0 / (height - 1), 1.0],
                      dtype=jnp.float32)
    p_coeffs = (P * scale[None, :, None]).reshape(batch_size * 12)

    # Free reshape of the flat pixel axis into (H, W).  No dtype cast here —
    # the kernel widens after the load, so bf16 inputs stream as bf16.
    pts = points.reshape(batch_size, points.shape[1], height, width)

    # Pad to sublane/lane-aligned spatial dims so output stores are never
    # masked and row chunking always exists (only copies for unaligned shapes).
    height_p = _round_up(height, 8)
    width_p = _round_up(width, 128)
    padded = (height_p != height) or (width_p != width)
    if padded:
        pts = jnp.pad(pts[:, :in_planes],
                      ((0, 0), (0, 0),
                       (0, height_p - height), (0, width_p - width)))
    # (When not padded, the BlockSpec below simply never reads plane 3.)

    itemsize = jnp.dtype(pts.dtype).itemsize
    # Double-buffered VMEM bytes per block pixel: input planes + 2 f32 outputs.
    bytes_per_px = 2 * (in_planes * itemsize + 2 * 4)
    vmem_cap = _vmem_capacity_bytes()
    max_block_px = max(8 * width_p, (vmem_cap // 8) // bytes_per_px)

    rows = (block_rows if block_rows is not None
            else _pick_block_rows(height_p, width_p, batch_size, max_block_px))
    assert height_p % rows == 0, "block_rows must divide the (padded) height"
    assert rows % 8 == 0 or rows == height_p, "block_rows must be a multiple of 8"
    n_row_blocks = height_p // rows

    vmem_limit = int(min(vmem_cap,
                         max(2 * bytes_per_px * rows * width_p + (4 << 20),
                             32 << 20)))

    kernel = functools.partial(_project3d_kernel, eps=eps,
                               use_w=not homogeneous_w)
    out = pl.pallas_call(
        kernel,
        out_shape=jax.ShapeDtypeStruct((batch_size, 2, height_p, width_p),
                                       jnp.float32),
        grid_spec=pltpu.PrefetchScalarGridSpec(
            num_scalar_prefetch=1,
            grid=(batch_size, n_row_blocks),
            in_specs=[
                pl.BlockSpec((None, in_planes, rows, width_p),
                             lambda b, h, p: (b, 0, h, 0)),
            ],
            out_specs=pl.BlockSpec((None, 2, rows, width_p),
                                   lambda b, h, p: (b, 0, h, 0)),
        ),
        compiler_params=pltpu.CompilerParams(
            dimension_semantics=("parallel", "parallel"),
            vmem_limit_bytes=vmem_limit,
        ),
    )(p_coeffs, pts)

    if padded:
        out = out[:, :, :height, :width]
    return out


def project_3d(points, K, T, batch_size, height, width, eps=1e-7,
               homogeneous_w=True, channels_last=True, block_rows=None):
    """Spec-compatible wrapper mirroring PyTorch Project3D.forward.

    channels_last=True  -> [B, H, W, 2] (exact module semantics).
    channels_last=False -> [B, 2, H, W] channel-first planes straight from the
                           kernel, with no extra HBM traffic — preferred for
                           performance-critical consumers (grid_sample-style
                           coords can index the x/y planes directly).
    """
    planes = project_3d_planes(points, K, T, batch_size, height, width,
                               eps=eps, homogeneous_w=homogeneous_w,
                               block_rows=block_rows)
    if not channels_last:
        return planes
    # NHWC interleave left to XLA: under jit with the consumer this transpose
    # fuses into the downstream gather; standalone it is one extra HBM round
    # trip, so fast paths should take channels_last=False instead.
    # TODO(synk): emitting interleaved NHWC f32 in-kernel needs a lane
    # interleave Mosaic does not lower reliably; a bf16 pack via pltpu.bitcast
    # would change output precision.
    return jnp.transpose(planes, (0, 2, 3, 1))


def project_3d_ref(points, K, T, batch_size, height, width, eps=1e-7):
    """Pure-JAX reference mirroring the PyTorch forward."""
    P = jnp.matmul(K, T)[:, :3, :]
    cam = jnp.matmul(P, points.astype(jnp.float32))
    pix = cam[:, :2, :] / (cam[:, 2:3, :] + eps)
    pix = pix.reshape(batch_size, 2, height, width).transpose(0, 2, 3, 1)
    pix = pix.at[..., 0].divide(width - 1)
    pix = pix.at[..., 1].divide(height - 1)
    return (pix - 0.5) * 2.0


def _make_inputs(B, H, W, key):
    k_pts, k_t = jax.random.split(key)
    HW = H * W
    pts_xyz = jax.random.normal(k_pts, (B, 3, HW), dtype=jnp.float32)
    pts_xyz = pts_xyz.at[:, 2, :].set(jnp.abs(pts_xyz[:, 2, :]) + 2.0)
    points = jnp.concatenate(
        [pts_xyz, jnp.ones((B, 1, HW), dtype=jnp.float32)], axis=1)
    K_single = jnp.array(
        [[0.58 * W, 0.0, 0.5 * W, 0.0],
         [0.0, 1.92 * H, 0.5 * H, 0.0],
         [0.0, 0.0, 1.0, 0.0],
         [0.0, 0.0, 0.0, 1.0]], dtype=jnp.float32)
    Kmat = jnp.broadcast_to(K_single, (B, 4, 4))
    Tmat = jnp.broadcast_to(jnp.eye(4, dtype=jnp.float32), (B, 4, 4))
    Tmat = Tmat + 0.01 * jax.random.normal(k_t, (B, 4, 4), dtype=jnp.float32)
    return points, Kmat, Tmat


if __name__ == "__main__":
    key = jax.random.PRNGKey(0)
    k1, k2 = jax.random.split(key)

    # Config 1: tiny, lane-unaligned width (exercises the W->128 padding path
    # and the >=4-block grid (2, 2)); check NHWC default and channel-first.
    B, H, W = 2, 16, 16
    points, Kmat, Tmat = _make_inputs(B, H, W, k1)
    ref = project_3d_ref(points, Kmat, Tmat, B, H, W)

    out_nhwc = jax.block_until_ready(project_3d(points, Kmat, Tmat, B, H, W))
    out_cf = jax.block_until_ready(
        project_3d(points, Kmat, Tmat, B, H, W, channels_last=False))
    assert out_nhwc.shape == (B, H, W, 2)
    assert out_cf.shape == (B, 2, H, W)
    assert jnp.allclose(out_nhwc, ref, atol=1e-4, rtol=1e-4)
    assert jnp.allclose(jnp.transpose(out_cf, (0, 2, 3, 1)), ref,
                        atol=1e-4, rtol=1e-4)

    # Config 2: generic path streaming the homogeneous w plane (+ manual
    # block_rows override).
    out_w = jax.block_until_ready(
        project_3d(points, Kmat, Tmat, B, H, W,
                   homogeneous_w=False, block_rows=8))
    assert jnp.allclose(out_w, ref, atol=1e-4, rtol=1e-4)

    # Config 3: lane-aligned width, batch 1 -> picker must produce >=4 row
    # blocks so both v7x TensorCores get work.
    B, H, W = 1, 32, 128
    points, Kmat, Tmat = _make_inputs(B, H, W, k2)
    ref = project_3d_ref(points, Kmat, Tmat, B, H, W)
    out = jax.block_until_ready(project_3d(points, Kmat, Tmat, B, H, W))
    assert out.shape == (B, H, W, 2)
    assert jnp.allclose(out, ref, atol=1e-4, rtol=1e-4)

    print("KERNEL_OK")
</pallas_src>

<mosaic_0001>
module attributes {stable_mosaic.version = 11 : i64} {
  func.func @_project3d_kernel(%arg0: i32, %arg1: i32, %arg2: memref<24xf32, #tpu.memory_space<smem>>, %arg3: memref<1x3x8x128xf32, #tpu.memory_space<vmem>>, %arg4: memref<1x2x8x128xf32, #tpu.memory_space<vmem>>) attributes {dimension_semantics = [#tpu.dimension_semantics<parallel>, #tpu.dimension_semantics<parallel>], iteration_bounds = array<i64: 2, 2>, scalar_prefetch = 1 : i64, scratch_operands = 0 : i64, tpu.core_type = #tpu.core_type<tc>, window_params = [{transform_indices = @transform_0, window_bounds = array<i64: 1, 3, 8, 128>}, {transform_indices = @transform_1, window_bounds = array<i64: 1, 2, 8, 128>}]} {
    %c12_i32 = arith.constant 12 : i32
    %0 = arith.muli %arg0, %c12_i32 : i32
    %c0 = arith.constant 0 : index
    %c0_0 = arith.constant 0 : index
    %c0_1 = arith.constant 0 : index
    %c0_2 = arith.constant 0 : index
    %1 = vector.load %arg3[%c0, %c0_0, %c0_1, %c0_2] : memref<1x3x8x128xf32, #tpu.memory_space<vmem>>, vector<1x1x8x128xf32>
    %2 = vector.shape_cast %1 : vector<1x1x8x128xf32> to vector<8x128xf32>
    %c0_3 = arith.constant 0 : index
    %c1 = arith.constant 1 : index
    %c0_4 = arith.constant 0 : index
    %c0_5 = arith.constant 0 : index
    %3 = vector.load %arg3[%c0_3, %c1, %c0_4, %c0_5] : memref<1x3x8x128xf32, #tpu.memory_space<vmem>>, vector<1x1x8x128xf32>
    %4 = vector.shape_cast %3 : vector<1x1x8x128xf32> to vector<8x128xf32>
    %c0_6 = arith.constant 0 : index
    %c2 = arith.constant 2 : index
    %c0_7 = arith.constant 0 : index
    %c0_8 = arith.constant 0 : index
    %5 = vector.load %arg3[%c0_6, %c2, %c0_7, %c0_8] : memref<1x3x8x128xf32, #tpu.memory_space<vmem>>, vector<1x1x8x128xf32>
    %6 = vector.shape_cast %5 : vector<1x1x8x128xf32> to vector<8x128xf32>
    %c0_i32 = arith.constant 0 : i32
    %7 = arith.addi %0, %c0_i32 : i32
    %8 = arith.index_cast %7 : i32 to index
    %9 = memref.load %arg2[%8] : memref<24xf32, #tpu.memory_space<smem>>
    %10 = vector.broadcast %9 : f32 to vector<8x128xf32>
    %11 = arith.mulf %10, %2 : vector<8x128xf32>
    %c1_i32 = arith.constant 1 : i32
    %12 = arith.addi %0, %c1_i32 : i32
    %13 = arith.index_cast %12 : i32 to index
    %14 = memref.load %arg2[%13] : memref<24xf32, #tpu.memory_space<smem>>
    %15 = vector.broadcast %14 : f32 to vector<8x128xf32>
    %16 = arith.mulf %15, %4 : vector<8x128xf32>
    %17 = arith.addf %11, %16 : vector<8x128xf32>
    %c2_i32 = arith.constant 2 : i32
    %18 = arith.addi %0, %c2_i32 : i32
    %19 = arith.index_cast %18 : i32 to index
    %20 = memref.load %arg2[%19] : memref<24xf32, #tpu.memory_space<smem>>
    %21 = vector.broadcast %20 : f32 to vector<8x128xf32>
    %22 = arith.mulf %21, %6 : vector<8x128xf32>
    %23 = arith.addf %17, %22 : vector<8x128xf32>
    %c3_i32 = arith.constant 3 : i32
    %24 = arith.addi %0, %c3_i32 : i32
    %25 = arith.index_cast %24 : i32 to index
    %26 = memref.load %arg2[%25] : memref<24xf32, #tpu.memory_space<smem>>
    %27 = vector.broadcast %26 : f32 to vector<8x128xf32>
    %28 = arith.addf %23, %27 : vector<8x128xf32>
    %c4_i32 = arith.constant 4 : i32
    %29 = arith.addi %0, %c4_i32 : i32
    %30 = arith.index_cast %29 : i32 to index
    %31 = memref.load %arg2[%30] : memref<24xf32, #tpu.memory_space<smem>>
    %32 = vector.broadcast %31 : f32 to vector<8x128xf32>
    %33 = arith.mulf %32, %2 : vector<8x128xf32>
    %c5_i32 = arith.constant 5 : i32
    %34 = arith.addi %0, %c5_i32 : i32
    %35 = arith.index_cast %34 : i32 to index
    %36 = memref.load %arg2[%35] : memref<24xf32, #tpu.memory_space<smem>>
    %37 = vector.broadcast %36 : f32 to vector<8x128xf32>
    %38 = arith.mulf %37, %4 : vector<8x128xf32>
    %39 = arith.addf %33, %38 : vector<8x128xf32>
    %c6_i32 = arith.constant 6 : i32
    %40 = arith.addi %0, %c6_i32 : i32
    %41 = arith.index_cast %40 : i32 to index
    %42 = memref.load %arg2[%41] : memref<24xf32, #tpu.memory_space<smem>>
    %43 = vector.broadcast %42 : f32 to vector<8x128xf32>
    %44 = arith.mulf %43, %6 : vector<8x128xf32>
    %45 = arith.addf %39, %44 : vector<8x128xf32>
    %c7_i32 = arith.constant 7 : i32
    %46 = arith.addi %0, %c7_i32 : i32
    %47 = arith.index_cast %46 : i32 to index
    %48 = memref.load %arg2[%47] : memref<24xf32, #tpu.memory_space<smem>>
    %49 = vector.broadcast %48 : f32 to vector<8x128xf32>
    %50 = arith.addf %45, %49 : vector<8x128xf32>
    %c8_i32 = arith.constant 8 : i32
    %51 = arith.addi %0, %c8_i32 : i32
    %52 = arith.index_cast %51 : i32 to index
    %53 = memref.load %arg2[%52] : memref<24xf32, #tpu.memory_space<smem>>
    %54 = vector.broadcast %53 : f32 to vector<8x128xf32>
    %55 = arith.mulf %54, %2 : vector<8x128xf32>
    %c9_i32 = arith.constant 9 : i32
    %56 = arith.addi %0, %c9_i32 : i32
    %57 = arith.index_cast %56 : i32 to index
    %58 = memref.load %arg2[%57] : memref<24xf32, #tpu.memory_space<smem>>
    %59 = vector.broadcast %58 : f32 to vector<8x128xf32>
    %60 = arith.mulf %59, %4 : vector<8x128xf32>
    %61 = arith.addf %55, %60 : vector<8x128xf32>
    %c10_i32 = arith.constant 10 : i32
    %62 = arith.addi %0, %c10_i32 : i32
    %63 = arith.index_cast %62 : i32 to index
    %64 = memref.load %arg2[%63] : memref<24xf32, #tpu.memory_space<smem>>
    %65 = vector.broadcast %64 : f32 to vector<8x128xf32>
    %66 = arith.mulf %65, %6 : vector<8x128xf32>
    %67 = arith.addf %61, %66 : vector<8x128xf32>
    %c11_i32 = arith.constant 11 : i32
    %68 = arith.addi %0, %c11_i32 : i32
    %69 = arith.index_cast %68 : i32 to index
    %70 = memref.load %arg2[%69] : memref<24xf32, #tpu.memory_space<smem>>
    %71 = vector.broadcast %70 : f32 to vector<8x128xf32>
    %72 = arith.addf %67, %71 : vector<8x128xf32>
    %cst = arith.constant 1.000000e-07 : f32
    %73 = vector.broadcast %cst : f32 to vector<8x128xf32>
    %74 = arith.addf %72, %73 : vector<8x128xf32>
    %75 = tpu.reciprocal %74 : vector<8x128xf32> -> vector<8x128xf32>
    %76 = arith.mulf %28, %75 : vector<8x128xf32>
    %cst_9 = arith.constant 1.000000e+00 : f32
    %77 = vector.broadcast %cst_9 : f32 to vector<8x128xf32>
    %78 = arith.subf %76, %77 : vector<8x128xf32>
    %c0_10 = arith.constant 0 : index
    %c0_11 = arith.constant 0 : index
    %c0_12 = arith.constant 0 : index
    %c0_13 = arith.constant 0 : index
    %79 = vector.load %arg4[%c0_10, %c0_11, %c0_12, %c0_13] : memref<1x2x8x128xf32, #tpu.memory_space<vmem>>, vector<1x1x8x128xf32>
    %80 = vector.shape_cast %79 : vector<1x1x8x128xf32> to vector<8x128xf32>
    %81 = vector.shape_cast %78 : vector<8x128xf32> to vector<1x1x8x128xf32>
    tpu.vector_store %arg4[%c0_10, %c0_11, %c0_12, %c0_13], %81 {strides = array<i32>} : memref<1x2x8x128xf32, #tpu.memory_space<vmem>>, vector<1x1x8x128xf32>,
    %82 = arith.mulf %50, %75 : vector<8x128xf32>
    %cst_14 = arith.constant 1.000000e+00 : f32
    %83 = vector.broadcast %cst_14 : f32 to vector<8x128xf32>
    %84 = arith.subf %82, %83 : vector<8x128xf32>
    %c0_15 = arith.constant 0 : index
    %c1_16 = arith.constant 1 : index
    %c0_17 = arith.constant 0 : index
    %c0_18 = arith.constant 0 : index
    %85 = vector.load %arg4[%c0_15, %c1_16, %c0_17, %c0_18] : memref<1x2x8x128xf32, #tpu.memory_space<vmem>>, vector<1x1x8x128xf32>
    %86 = vector.shape_cast %85 : vector<1x1x8x128xf32> to vector<8x128xf32>
    %87 = vector.shape_cast %84 : vector<8x128xf32> to vector<1x1x8x128xf32>
    tpu.vector_store %arg4[%c0_15, %c1_16, %c0_17, %c0_18], %87 {strides = array<i32>} : memref<1x2x8x128xf32, #tpu.memory_space<vmem>>, vector<1x1x8x128xf32>,
    return
  }
  func.func @transform_0(%arg0: i32, %arg1: i32, %arg2: memref<24xf32, #tpu.memory_space<smem>>) -> (i32, i32, i32, i32) {
    %c0_i32 = arith.constant 0 : i32
    %c0_i32_0 = arith.constant 0 : i32
    %c0_i32_1 = arith.constant 0 : i32
    return %arg0, %c0_i32, %arg1, %c0_i32_0 : i32, i32, i32, i32
  }
  func.func @transform_1(%arg0: i32, %arg1: i32, %arg2: memref<24xf32, #tpu.memory_space<smem>>) -> (i32, i32, i32, i32) {
    %c0_i32 = arith.constant 0 : i32
    %c0_i32_0 = arith.constant 0 : i32
    %c0_i32_1 = arith.constant 0 : i32
    return %arg0, %c0_i32, %arg1, %c0_i32_0 : i32, i32, i32, i32
  }
}

</mosaic_0001>

<bundles_post_ra>
// kernel: tpu_custom_call.1
= control target key start
LH: loop header
LB: loop body
LE: loop exit
PB: predicated region body
PF: predicated region fallthrough
CT: control target
= control target key end

     0   :  { %s600_s12 = smov [#allocation3]   ;;  %s783_s0 = inlined_call_operand.hbm [shape: f32[24], index: 0, kind: input, shape index: {}]   ;;  %s784_s1 = inlined_call_operand.hbm [shape: f32[2,3,16,128], index: 1, kind: input, shape index: {}]   ;;  %s785_s2 = inlined_call_operand.hbm [shape: f32[2,2,16,128], index: 2, kind: output, shape index: {}]  }
   0x1   :  { %787 = sst [smem:[#allocation12_spill]] %s784_s1  ;;  %s8_s11 = sshll.u32 %s783_s0, 4  ;;  %s9_s11 = int_to_ptr.hbm [resolvable:$true] %s8_s11 }
   0x2   :  { %11 = dma.hbm_to_smem %s9_s11, 16, %s600_s12, [#allocation2] }
   0x3   :  { %558 = dma.done.wait [#allocation2], 16 }
   0x4   :  { %559 = vsyncadd [#allocation2], 4294967280 }
   0x5   :  { %14 = sfence }
   0x6   :  { %15 = vsyncpa [#allocation5], 0 }
   0x7   :  { %17 = vsyncpa [#allocation5 + $0x1], 0 }
   0x8   :  { %18 = vsyncpa [#allocation6], 0 }
   0x9   :  { %20 = vsyncpa [#allocation6 + $0x1], 0  ;;  %s625_s13 = smov 0   ;;  %s627_s14 = smov 0  }
   0xa   :  { %s629_s15 = smov 0   ;;  %s631_s16 = smov 0  }
   0xb   :  { %s633_s17 = smov 0   ;;  %s635_s0 = smov 0  }
   0xc   :  { %s637_s18 = smov 0   ;;  %s639_s19 = smov 0  }
   0xd LB: > { %s349_s20 = sadd.s32 4294967295, %s598_s19   ;;  %s350_s21 = sadd.s32 4294967294, %s598_s19   ;;  %s598_s19 = sphi %s639_s19, %s26_s19   ;;  %s594_s18 = sphi %s637_s18, %s801_s18   ;;  %s590_s0 = sphi %s635_s0, %s800_s0   ;;  %s586_s17 = sphi %s633_s17, %s799_s17   ;;  %s582_s16 = sphi %s631_s16, %s798_s16   ;;  %s578_s15 = sphi %s629_s15, %s797_s15   ;;  %s574_s14 = sphi %s627_s14, %s796_s14   ;;  %s570_s13 = sphi %s625_s13, %s795_s13  }
   0xe   : > { %s35_s22 = sadd.s32 1, %s590_s0  ;;  %s38_s23 = sadd.s32 1, %s594_s18 }
   0xf   : > { %p36_p0 = scmp.ge.s32.totalorder %s35_s22, 2  ;;  %s47_s24 = sadd.s32 1, %s578_s15 }
  0x10   : > { %p54_p1 = scmp.ne.s32.totalorder %s578_s15, %s574_s14  ;;  %p55_p2 = scmp.eq.s32.totalorder %s598_s19, 0 }
  0x11   : > { %s803_s22 = smov (%p36_p0, %s35_s22), 0  ;;  %s805_s23 = smov (!%p36_p0, %s38_s23), %s594_s18 }
  0x12   : > { %s43_s25 = ssub.s32 %s590_s0, %s803_s22  ;;  %p678_p3 = por %p55_p2, %p54_p1 }
  0x13   : > { %p40_p4 = scmp.ge.s32.totalorder %s805_s23, 2  ;;  %p60_p5 = scmp.ne.s32.totalorder %s574_s14, %s570_s13 }
  0x14   : > { %p61_p6 = scmp.eq.s32.totalorder %s349_s20, 0  ;;  %p86_p7 = scmp.eq.s32.totalorder %s349_s20, 3 }
  0x15   : > { %s807_s23 = smov (%p40_p4, %s805_s23), 0  ;;  %p92_p10 = scmp.eq.s32.totalorder %s350_s21, 3 }
  0x16   : > { %789 = sst [smem:[#allocation11_spill]] %s807_s23  ;;  %p686_p8 = por %p61_p6, %p60_p5 }
  0x17   : > { %p690_p9 = por %p86_p7, %p54_p1  ;;  %s42_s29 = ssub.s32 %s594_s18, %s807_s23 }
  0x18   : > { %s44_s30 = sor.u32 %s43_s25, %s42_s29  ;;  %p696_p12 = por %p92_p10, %p60_p5 }
  0x19   : > { %p45_p11 = scmp.eq.s32.totalorder %s44_s30, 0  ;;  %p381_p13 = scmp.lt.s32.totalorder %s598_s19, 4 }
  0x1a   : > { %s112_s4 = sand.u32 1, %s578_s15   ;;  %s367_s7 = smul.u32 6, %s594_s18 }
  0x1b   : > { %s703_s5 = scalar_select %p45_p11, %s578_s15, %s47_s24  }
  0x1c   : > { %s366_s6 = smul.u32 24, %s112_s4  ;;  %p374_p0 = pnand %p381_p13, %p678_p3 }
  0x1d   : > { %s120_s8 = sadd.s32 %s590_s0, %s367_s7  ;;  %s793_s1 = sld [smem:[#allocation12_spill]] }
  0x1e   : > { %s116_s9 = scalar_lea.vmem [#allocation4], %s366_s6  ;;  %s353_s11 = sshll.u32 %s120_s8, 3 }
  0x1f   : > { %s125_s10 = sshll.u32 %s116_s9, 4  ;;  %s113_s29 = scalar_lea.sflag [#allocation5], %s112_s4  ;;  %s126_s10 = int_to_ptr.vmem [resolvable:$true] %s125_s10 }
  0x20   : > { %s601_s24 = smov 256   ;;  %s602_s30 = smov 128  }
  0x21   : > { %s603_s23 = smov 8   ;;  %p354_p1 = scmp.ge.s32.totalorder %s598_s19, 1 }
  0x22   : > { %p133_p2 = scmp.lt.s32.totalorder %s598_s19, 5 }
  0x23   : > { %s122_s21 = scalar_lea.hbm %s793_s1, %s353_s11 }
  0x24   : > { %s123_s25 = sshll.u32 %s122_s21, 4  ;;  %p134_p4 = pnand %p354_p1, %p133_p2  ;;  %s124_s25 = int_to_ptr.hbm [resolvable:$true] %s123_s25 }
  0x25   : > { %376 = dma.hbm_to_vmem [thread:$0]  (!%p374_p0), %s124_s25, 384, %s126_s10, %s113_s29, %s601_s24, %s602_s30, %s603_s23  }
  0x26   : > { %137 = sbr.rel (%p134_p4) target bundleno = 92 (0x5c), region = 24  ;;  %s715_s26 = sand.u32 (!%p134_p4), 1, %s574_s14  }
  0x27   : > { %s368_s6 = smul.u32 (!%p134_p4), 24, %s715_s26  ;;  %s140_s7 = scalar_lea.sflag (!%p134_p4), [#allocation5], %s715_s26 }
  0x29   : > { %s143_s8 = scalar_lea.vmem (!%p134_p4), [#allocation4], %s368_s6 }
  0x2b   : > { %561 = dma.done.wait (%p686_p8), %s140_s7, 384  }
  0x2c   : > { %563 = vsyncadd (%p686_p8), %s140_s7, 4294966912  ;;  %s724_s23 = smul.u32 12, %s586_s17  ;;  %v164_v0 = vld [vmem:[%s143_s8] sm:$0xff]  ;;  %v356_v1 = vld [vmem:[%s143_s8 + $0x8] sm:$0xff] }
  0x2d   : > { %v357_v2 = vld [vmem:[%s143_s8 + $0x10] sm:$0xff] }
  0x2e   : > { %s172_s4 = sadd.s32 1, %s724_s23  ;;  %s204_s9 = sadd.s32 8, %s724_s23 }
  0x2f   : > { %s205_s10 = sld [smem:[#allocation3 + %s204_s9]]  ;;  %s208_s11 = sadd.s32 9, %s724_s23 }
  0x30   : > { %s209_s12 = sld [smem:[#allocation3 + %s208_s11]]  ;;  %s213_s20 = sadd.s32 10, %s724_s23 }
  0x31   : > { %s214_s27 = sld [smem:[#allocation3 + %s213_s20]]  ;;  %s218_s21 = sadd.s32 11, %s724_s23 }
  0x32   : > { %s219_s25 = sld [smem:[#allocation3 + %s218_s21]]  ;;  %s186_s24 = sadd.s32 4, %s724_s23 }
  0x33   : > { %s169_s29 = sld [smem:[#allocation3 + %s724_s23]]  ;;  %s190_s6 = sadd.s32 5, %s724_s23 }
  0x34   : > { %s173_s30 = sld [smem:[#allocation3 + %s172_s4]]  ;;  %s177_s1 = sadd.s32 2, %s724_s23 }
  0x35   : > { %v206_v3 = vstv %s205_s10  ;;  %s187_s7 = sld [smem:[#allocation3 + %s186_s24]]  ;;  %s195_s11 = sadd.s32 6, %s724_s23 }
  0x36   : > { %v207_v4 = vmul.f32 %v206_v3, %v164_v0  ;;  %v210_v5 = vstv %s209_s12  ;;  %s191_s9 = sld [smem:[#allocation3 + %s190_s6]]  ;;  %s182_s8 = sadd.s32 3, %s724_s23 }
  0x37   : > { %v211_v6 = vmul.f32 %v356_v1, %v210_v5  ;;  %v215_v7 = vstv %s214_s27  ;;  %s178_s20 = sld [smem:[#allocation3 + %s177_s1]]  ;;  %s200_s4 = sadd.s32 7, %s724_s23 }
  0x38   : > { %v216_v8 = vmul.f32 %v357_v2, %v215_v7  ;;  %v220_v10 = vstv %s219_s25  ;;  %s196_s21 = sld [smem:[#allocation3 + %s195_s11]]  ;;  %s362_s12 = sshll.u32 %s586_s17, 2 }
  0x39   : > { %v212_v9 = vadd.f32 %v211_v6, %v207_v4  ;;  %v170_v12 = vstv %s169_s29  ;;  %s183_s1 = sld [smem:[#allocation3 + %s182_s8]]  ;;  %s255_s23 = sadd.s32 %s582_s16, %s362_s12 }
  0x3a   : > { %v174_v14 = vstv %s173_s30  ;;  %v171_v18 = vmul.f32 %v170_v12, %v164_v0  ;;  %s201_s10 = sld [smem:[#allocation3 + %s200_s4]]  ;;  %s355_s27 = sshll.u32 %s715_s26, 4 }
  0x3b   : > { %v217_v11 = vadd.f32 %v216_v8, %v212_v9  ;;  %v188_v15 = vstv %s187_s7  ;;  %v175_v19 = vmul.f32 %v356_v1, %v174_v14  ;;  %s363_s25 = sshll.u32 %s255_s23, 3  ;;  %s162_s24 = scalar_lea.vmem [#allocation7], %s355_s27 }
  0x3c   : > { %v192_v16 = vstv %s191_s9  ;;  %v189_v20 = vmul.f32 %v188_v15, %v164_v0  ;;  %s257_s16 = scalar_lea.hbm %s785_s2, %s363_s25  ;;  %s258_s30 = sshll.u32 %s162_s24, 4  ;;  %s259_s30 = int_to_ptr.vmem [resolvable:$true] %s258_s30 }
  0x3d   : > { %v221_v13 = vadd.f32 %v220_v10, %v217_v11  ;;  %v193_v21 = vmul.f32 %v356_v1, %v192_v16  ;;  %v179_v22 = vstv %s178_s20  ;;  %v176_v24 = vadd.f32 %v175_v19, %v171_v18  ;;  %s260_s6 = sshll.u32 %s257_s16, 4  ;;  %s245_s7 = scalar_lea.sflag [#allocation6], %s715_s26  ;;  %s261_s6 = int_to_ptr.hbm [resolvable:$true] %s260_s6 }
  0x3e   : > { %v197_v23 = vstv %s196_s21  ;;  %v180_v25 = vmul.f32 %v357_v2, %v179_v22  ;;  %s512_s9 = sshra.s32 %s261_s6, 4  ;;  %s518_s8 = scalar_lea.hbm %s785_s2, 64  ;;  %s513_s9 = int_to_ptr.hbm [resolvable:$true] %s512_s9 }
  0x3f   : > { %v222_v17 = vadd.f32 1e-07, %v221_v13  ;;  %v194_v26 = vadd.f32 %v193_v21, %v189_v20  ;;  %v198_v27 = vmul.f32 %v357_v2, %v197_v23  ;;  %v184_v35 = vstv %s183_s1  ;;  %s514_s11 = scalar_lea.hbm %s513_s9, 16  ;;  %p519_p7 = scmp.lt.s32.totalorder %s513_s9, %s785_s2 }
  0x40   : > { %v181_v30 = vadd.f32 %v180_v25, %v176_v24  ;;  %v202_v36 = vstv %s201_s10  ;;  %p515_p3 = scmp.ne.s32.totalorder %s513_s9, %s514_s11  ;;  %p520_p8 = scmp.lt.s32.totalorder %s518_s8, %s514_s11 }
  0x41   : > { %454 = vrcp.f32 %v222_v17  ;;  %v234_v31 = vand.u32 2147483648, %v222_v17  ;;  %v199_v32 = vadd.f32 %v198_v27, %v194_v26  ;;  %vm228_vm0 = vweird.f32 %v222_v17 }
  0x42   : > { %v232_v34 = vand.u32 2147483647, %v222_v17  ;;  %v185_v39 = vadd.f32 %v184_v35, %v181_v30  ;;  %p516_p5 = pnand %p515_p3, %p690_p9  ;;  %p521_p10 = por %p520_p8, %p519_p7 }
  0x43   : > { %v235_v38 = vor.u32 1.1754944e-38, %v234_v31  ;;  %v203_v41 = vadd.f32 %v202_v36, %v199_v32 }
  0x44   : > { %vm233_vm3 = vcmp.eq.f32.partialorder %v232_v34, 8.507059e+37  ;;  %p517_p6 = pneg %p516_p5 }
  0x46   : > { %p522_p11 = pnand %p521_p10, %p517_p6 }
  0x47   : > { %v455_v28 = vpop.eup %454 }
  0x48   : > { %v224_v29 = vmul.f32 %v455_v28, %v222_v17  ;;  %vm229_vm1 = vweird.f32 %v455_v28 }
  0x49   : > { %vm230_vm2 = vmor %vm228_vm0, %vm229_vm1 }
  0x4a   : > { %v225_v33 = vsub.f32 1.0, %v224_v29 }
  0x4c   : > { %v226_v37 = vmul.f32 %v455_v28, %v225_v33 }
  0x4e   : > { %v227_v40 = vadd.f32 %v455_v28, %v226_v37 }
  0x50   : > { %v231_v42 = vsel %vm230_vm2, %v455_v28, %v227_v40 }
  0x51   : > { %v236_v43 = vsel %vm233_vm3, %v235_v38, %v231_v42 }
  0x52   : > { %v237_v44 = vmul.f32 %v236_v43, %v185_v39  ;;  %v240_v45 = vmul.f32 %v236_v43, %v203_v41 }
  0x54   : > { %v358_v46 = vadd.f32 -1.0, %v237_v44  ;;  %v359_v47 = vadd.f32 -1.0, %v240_v45 }
  0x56   : > { %239 = vst [vmem:[%s162_s24] sm:$0xff] %v358_v46 }
  0x57   : > { %360 = vst [vmem:[%s162_s24 + $0x8] sm:$0xff] %v359_v47 }
  0x58   : > { %525 = shalt.err (!%p522_p11)
}
  0x59   : > { %s604_s26 = smov 128   ;;  %s605_s10 = smov 256  }
  0x5a   : > { %s606_s12 = smov 8  }
  0x5b   : > { %371 = dma.vmem_to_hbm [thread:$0]  (%p690_p9), %s259_s30, 256, %s261_s6, %s245_s7, %s604_s26, %s605_s10, %s606_s12  }
  0x5c PF: > { %p382_p13 = scmp.ge.s32.totalorder %s598_s19, 2  ;;  %s275_s23 = sand.u32 1, %s570_s13  }
  0x5d   : > { %s276_s27 = scalar_lea.sflag [#allocation6], %s275_s23 }
  0x5e   : > { %p378_p0 = pnand %p382_p13, %p696_p12 }
  0x60   : > { %p379_p1 = pneg %p378_p0 }
  0x62   : > { %565 = dma.done.wait (%p379_p1), %s276_s27, 256  }
  0x63   : > { %567 = vsyncadd (%p379_p1), %s276_s27, 4294967040  ;;  %s26_s19 = sadd.s32 1, %s598_s19   ;;  %s794_s28 = sld [smem:[#allocation11_spill]] }
  0x64   : > { %p23_p2 = scmp.ge.s32.totalorder %s26_s19, 6   ;;  %s795_s13 = smov %s574_s14 }
  0x65   : > { %s796_s14 = smov %s578_s15  ;;  %s797_s15 = smov %s703_s5 }
  0x66   : > { %s798_s16 = smov %s590_s0  ;;  %s799_s17 = smov %s594_s18 }
  0x67   : > { %s800_s0 = smov %s803_s22  ;;  %25 = sbr.rel (!%p23_p2) target bundleno = 13 (0xd), region = 72 }
  0x69   : > { %s801_s18 = smov %s794_s28 }
  0x6c   :  { %282 = vsyncpa [#allocation5], 1 }
  0x6d   :  { %284 = vsyncpa [#allocation5 + $0x1], 1 }
  0x6e   :  { %285 = vsyncpa [#allocation6], 1 }
  0x6f   :  { %287 = vsyncpa [#allocation6 + $0x1], 1 }

</bundles_post_ra>
